<compile_context>
chip_gen: v7x
topology: tpu7x:2x2x1
jax: 0.10.0
libtpu: 0.0.40
codegen_flags: <defaults>
</compile_context>

<pallas_src>
import jax
import jax.numpy as jnp
from jax.experimental import pallas as pl
from jax.experimental.pallas import tpu as pltpu

# ----------------------------- problem sizes --------------------------------
Z = 32          # latent dim (padded to ZP inside the wrapper)
ZP = 128        # padded contraction depth for the first matmul
H = 128         # hidden dim (lane-aligned)
C, IMG = 1, 16  # output image: (C, IMG, IMG)
OUT = C * IMG * IMG   # 256, lane-aligned
MAX_TB = 256    # max batch tile per grid step (fills MXU rows)


# ------------------------------ Pallas kernel --------------------------------
def generator_kernel(z_ref, w1_ref, b1_ref, w2_ref, b2_ref, w3_ref, b3_ref,
                     o_ref):
    """Fused 3-layer MLP generator for one batch tile.

    z/w are bf16 (MXU-native inputs), accumulation is f32 via
    preferred_element_type, bias + relu/tanh run in f32 on the VPU/EUP, and
    activations are cast back to bf16 only where they feed the next matmul.
    """
    z = z_ref[...]                                               # (tb, ZP) bf16
    h1 = jnp.dot(z, w1_ref[...], preferred_element_type=jnp.float32)
    h1 = jnp.maximum(h1 + b1_ref[...], 0.0)                      # (tb, H) f32
    h2 = jnp.dot(h1.astype(jnp.bfloat16), w2_ref[...],
                 preferred_element_type=jnp.float32)
    h2 = jnp.maximum(h2 + b2_ref[...], 0.0)                      # (tb, H) f32
    h3 = jnp.dot(h2.astype(jnp.bfloat16), w3_ref[...],
                 preferred_element_type=jnp.float32)
    o_ref[...] = jnp.tanh(h3 + b3_ref[...])                      # (tb, OUT) f32


def generator_forward(z, w1, b1, w2, b2, w3, b3):
    """Batch-tiled pallas_call: z/out pipeline over the grid, weights stay
    VMEM-resident.  Flat lane-dense output is reshaped to NCHW in plain JAX."""
    bn, z_in = z.shape
    h = w1.shape[1]
    out_d = w3.shape[1]

    # Zero-pad the latent contraction depth to a MXU-friendly 128 (identity).
    if z_in < ZP:
        z = jnp.pad(z, ((0, 0), (0, ZP - z_in)))
        w1 = jnp.pad(w1, ((0, ZP - z_in), (0, 0)))

    # Pick a batch tile: sublane-aligned (multiple of 8), capped at MAX_TB so
    # small demo batches are not padded up to 256 rows.
    b8 = 8 * pl.cdiv(bn, 8)
    tb = min(MAX_TB, b8)
    nb = pl.cdiv(b8, tb)
    bp = nb * tb
    if bp != bn:
        z = jnp.pad(z, ((0, bp - bn), (0, 0)))

    # bf16 for MXU inputs; biases stay f32 for the elementwise epilogue.
    z_bf = z.astype(jnp.bfloat16)
    w1_bf = w1.astype(jnp.bfloat16)
    w2_bf = w2.astype(jnp.bfloat16)
    w3_bf = w3.astype(jnp.bfloat16)

    flat = pl.pallas_call(
        generator_kernel,
        out_shape=jax.ShapeDtypeStruct((bp, out_d), jnp.float32),
        grid=(nb,),
        in_specs=[
            pl.BlockSpec((tb, ZP), lambda i: (i, 0)),     # z: tiles over batch
            pl.BlockSpec((ZP, h), lambda i: (0, 0)),      # w1: VMEM-resident
            pl.BlockSpec((1, h), lambda i: (0, 0)),       # b1
            pl.BlockSpec((h, h), lambda i: (0, 0)),       # w2
            pl.BlockSpec((1, h), lambda i: (0, 0)),       # b2
            pl.BlockSpec((h, out_d), lambda i: (0, 0)),   # w3
            pl.BlockSpec((1, out_d), lambda i: (0, 0)),   # b3
        ],
        out_specs=pl.BlockSpec((tb, out_d), lambda i: (i, 0)),
        compiler_params=pltpu.CompilerParams(
            dimension_semantics=("parallel",),            # dual-TC on v7x
            vmem_limit_bytes=8 * 1024 * 1024,
        ),
    )(z_bf, w1_bf, b1, w2_bf, b2, w3_bf, b3)

    # layout: drop batch padding, then reshape flat pixels (B, C*H*W) -> NCHW.
    return flat[:bn].reshape(bn, C, IMG, IMG)


# ------------------------------- reference -----------------------------------
def generator_ref(z, w1, b1, w2, b2, w3, b3):
    """Pure-JAX reference mirroring the kernel's bf16-input / f32-accum math."""
    w1b, w2b, w3b = (w.astype(jnp.bfloat16) for w in (w1, w2, w3))
    h1 = jnp.dot(z.astype(jnp.bfloat16), w1b,
                 preferred_element_type=jnp.float32)
    h1 = jnp.maximum(h1 + b1, 0.0)
    h2 = jnp.dot(h1.astype(jnp.bfloat16), w2b,
                 preferred_element_type=jnp.float32)
    h2 = jnp.maximum(h2 + b2, 0.0)
    h3 = jnp.dot(h2.astype(jnp.bfloat16), w3b,
                 preferred_element_type=jnp.float32)
    return jnp.tanh(h3 + b3).reshape(z.shape[0], C, IMG, IMG)


# --------------------------------- main ---------------------------------------
if __name__ == "__main__":
    key = jax.random.PRNGKey(0)
    kz, k1, k2, k3 = jax.random.split(key, 4)

    # Small, deterministic synthetic inputs / parameters (DCGAN-style init).
    B = 8
    z  = jax.random.normal(kz, (B, Z), dtype=jnp.float32)
    w1 = 0.02 * jax.random.normal(k1, (Z, H), dtype=jnp.float32)
    b1 = jnp.zeros((1, H), dtype=jnp.float32)
    w2 = 0.02 * jax.random.normal(k2, (H, H), dtype=jnp.float32)
    b2 = jnp.zeros((1, H), dtype=jnp.float32)
    w3 = 0.02 * jax.random.normal(k3, (H, OUT), dtype=jnp.float32)
    b3 = jnp.zeros((1, OUT), dtype=jnp.float32)

    out = generator_forward(z, w1, b1, w2, b2, w3, b3)
    out = jax.block_until_ready(out)

    ref = generator_ref(z, w1, b1, w2, b2, w3, b3)
    assert out.shape == (B, C, IMG, IMG), out.shape
    # Tolerance loosened for bf16 matmul inputs (f32 accumulation).
    assert jnp.allclose(out, ref, atol=2e-2, rtol=2e-2), "mismatch vs reference"

    print("KERNEL_OK")
</pallas_src>

<mosaic_0001>
module attributes {stable_mosaic.version = 11 : i64} {
  func.func @generator_kernel(%arg0: i32, %arg1: memref<8x128xbf16, #tpu.memory_space<vmem>>, %arg2: memref<128x128xbf16, #tpu.memory_space<vmem>>, %arg3: memref<1x128xf32, #tpu.memory_space<vmem>>, %arg4: memref<128x128xbf16, #tpu.memory_space<vmem>>, %arg5: memref<1x128xf32, #tpu.memory_space<vmem>>, %arg6: memref<128x256xbf16, #tpu.memory_space<vmem>>, %arg7: memref<1x256xf32, #tpu.memory_space<vmem>>, %arg8: memref<8x256xf32, #tpu.memory_space<vmem>>) attributes {dimension_semantics = [#tpu.dimension_semantics<parallel>], iteration_bounds = array<i64: 1>, scalar_prefetch = 0 : i64, scratch_operands = 0 : i64, tpu.core_type = #tpu.core_type<tc>, window_params = [{transform_indices = @transform_0, window_bounds = array<i64: 8, 128>}, {pipeline_mode = #tpu.pipeline_mode<synchronous>, transform_indices = @transform_1, window_bounds = array<i64: 128, 128>}, {pipeline_mode = #tpu.pipeline_mode<synchronous>, transform_indices = @transform_2, window_bounds = array<i64: 1, 128>}, {pipeline_mode = #tpu.pipeline_mode<synchronous>, transform_indices = @transform_3, window_bounds = array<i64: 128, 128>}, {pipeline_mode = #tpu.pipeline_mode<synchronous>, transform_indices = @transform_4, window_bounds = array<i64: 1, 128>}, {pipeline_mode = #tpu.pipeline_mode<synchronous>, transform_indices = @transform_5, window_bounds = array<i64: 128, 256>}, {pipeline_mode = #tpu.pipeline_mode<synchronous>, transform_indices = @transform_6, window_bounds = array<i64: 1, 256>}, {transform_indices = @transform_7, window_bounds = array<i64: 8, 256>}]} {
    %c0 = arith.constant 0 : index
    %c0_0 = arith.constant 0 : index
    %0 = vector.load %arg1[%c0, %c0_0] : memref<8x128xbf16, #tpu.memory_space<vmem>>, vector<8x128xbf16>
    %c0_1 = arith.constant 0 : index
    %c0_2 = arith.constant 0 : index
    %1 = vector.load %arg2[%c0_1, %c0_2] : memref<128x128xbf16, #tpu.memory_space<vmem>>, vector<128x128xbf16>
    %cst = arith.constant dense<0.000000e+00> : vector<8x128xf32>
    %2 = tpu.matmul %0, %1, %cst {dimension_numbers = #tpu.dot_dimension_numbers<[1], [0], [0], [1], [0, 0, 1, 1], [], []>} : vector<8x128xbf16>, vector<128x128xbf16>, vector<8x128xf32> -> vector<8x128xf32>
    %c0_3 = arith.constant 0 : index
    %c0_4 = arith.constant 0 : index
    %3 = vector.load %arg3[%c0_3, %c0_4] : memref<1x128xf32, #tpu.memory_space<vmem>>, vector<1x128xf32>
    %4 = vector.broadcast %3 : vector<1x128xf32> to vector<8x128xf32>
    %5 = arith.addf %2, %4 : vector<8x128xf32>
    %cst_5 = arith.constant 0.000000e+00 : f32
    %6 = vector.broadcast %cst_5 : f32 to vector<8x128xf32>
    %7 = arith.maximumf %5, %6 : vector<8x128xf32>
    %8 = arith.truncf %7 : vector<8x128xf32> to vector<8x128xbf16>
    %c0_6 = arith.constant 0 : index
    %c0_7 = arith.constant 0 : index
    %9 = vector.load %arg4[%c0_6, %c0_7] : memref<128x128xbf16, #tpu.memory_space<vmem>>, vector<128x128xbf16>
    %cst_8 = arith.constant dense<0.000000e+00> : vector<8x128xf32>
    %10 = tpu.matmul %8, %9, %cst_8 {dimension_numbers = #tpu.dot_dimension_numbers<[1], [0], [0], [1], [0, 0, 1, 1], [], []>} : vector<8x128xbf16>, vector<128x128xbf16>, vector<8x128xf32> -> vector<8x128xf32>
    %c0_9 = arith.constant 0 : index
    %c0_10 = arith.constant 0 : index
    %11 = vector.load %arg5[%c0_9, %c0_10] : memref<1x128xf32, #tpu.memory_space<vmem>>, vector<1x128xf32>
    %12 = vector.broadcast %11 : vector<1x128xf32> to vector<8x128xf32>
    %13 = arith.addf %10, %12 : vector<8x128xf32>
    %cst_11 = arith.constant 0.000000e+00 : f32
    %14 = vector.broadcast %cst_11 : f32 to vector<8x128xf32>
    %15 = arith.maximumf %13, %14 : vector<8x128xf32>
    %16 = arith.truncf %15 : vector<8x128xf32> to vector<8x128xbf16>
    %c0_12 = arith.constant 0 : index
    %c0_13 = arith.constant 0 : index
    %17 = vector.load %arg6[%c0_12, %c0_13] : memref<128x256xbf16, #tpu.memory_space<vmem>>, vector<128x256xbf16>
    %cst_14 = arith.constant dense<0.000000e+00> : vector<8x256xf32>
    %18 = tpu.matmul %16, %17, %cst_14 {dimension_numbers = #tpu.dot_dimension_numbers<[1], [0], [0], [1], [0, 0, 1, 1], [], []>} : vector<8x128xbf16>, vector<128x256xbf16>, vector<8x256xf32> -> vector<8x256xf32>
    %c0_15 = arith.constant 0 : index
    %c0_16 = arith.constant 0 : index
    %19 = vector.load %arg7[%c0_15, %c0_16] : memref<1x256xf32, #tpu.memory_space<vmem>>, vector<1x256xf32>
    %20 = vector.broadcast %19 : vector<1x256xf32> to vector<8x256xf32>
    %21 = arith.addf %18, %20 : vector<8x256xf32>
    %22 = math.tanh %21 : vector<8x256xf32>
    %c0_17 = arith.constant 0 : index
    %c0_18 = arith.constant 0 : index
    %23 = vector.load %arg8[%c0_17, %c0_18] : memref<8x256xf32, #tpu.memory_space<vmem>>, vector<8x256xf32>
    tpu.vector_store %arg8[%c0_17, %c0_18], %22 {strides = array<i32>} : memref<8x256xf32, #tpu.memory_space<vmem>>, vector<8x256xf32>,
    return
  }
  func.func @transform_0(%arg0: i32) -> (i32, i32) {
    %c0_i32 = arith.constant 0 : i32
    %c0_i32_0 = arith.constant 0 : i32
    return %arg0, %c0_i32 : i32, i32
  }
  func.func @transform_1(%arg0: i32) -> (i32, i32) {
    %c0_i32 = arith.constant 0 : i32
    %c0_i32_0 = arith.constant 0 : i32
    %c0_i32_1 = arith.constant 0 : i32
    return %c0_i32, %c0_i32_0 : i32, i32
  }
  func.func @transform_2(%arg0: i32) -> (i32, i32) {
    %c0_i32 = arith.constant 0 : i32
    %c0_i32_0 = arith.constant 0 : i32
    %c0_i32_1 = arith.constant 0 : i32
    return %c0_i32, %c0_i32_0 : i32, i32
  }
  func.func @transform_3(%arg0: i32) -> (i32, i32) {
    %c0_i32 = arith.constant 0 : i32
    %c0_i32_0 = arith.constant 0 : i32
    %c0_i32_1 = arith.constant 0 : i32
    return %c0_i32, %c0_i32_0 : i32, i32
  }
  func.func @transform_4(%arg0: i32) -> (i32, i32) {
    %c0_i32 = arith.constant 0 : i32
    %c0_i32_0 = arith.constant 0 : i32
    %c0_i32_1 = arith.constant 0 : i32
    return %c0_i32, %c0_i32_0 : i32, i32
  }
  func.func @transform_5(%arg0: i32) -> (i32, i32) {
    %c0_i32 = arith.constant 0 : i32
    %c0_i32_0 = arith.constant 0 : i32
    %c0_i32_1 = arith.constant 0 : i32
    return %c0_i32, %c0_i32_0 : i32, i32
  }
  func.func @transform_6(%arg0: i32) -> (i32, i32) {
    %c0_i32 = arith.constant 0 : i32
    %c0_i32_0 = arith.constant 0 : i32
    %c0_i32_1 = arith.constant 0 : i32
    return %c0_i32, %c0_i32_0 : i32, i32
  }
  func.func @transform_7(%arg0: i32) -> (i32, i32) {
    %c0_i32 = arith.constant 0 : i32
    %c0_i32_0 = arith.constant 0 : i32
    return %arg0, %c0_i32 : i32, i32
  }
}

</mosaic_0001>

<bundles_post_ra>
// kernel: tpu_custom_call.1
= control target key start
LH: loop header
LB: loop body
LE: loop exit
PB: predicated region body
PF: predicated region fallthrough
CT: control target
= control target key end

     0   :  { %12 = vsyncpa [#allocation3], 0  ;;  %s871_s0 = inlined_call_operand.hbm [shape: bf16[8,128], index: 0, kind: input, shape index: {}]   ;;  %s872_s1 = inlined_call_operand.hbm [shape: bf16[128,128], index: 1, kind: input, shape index: {}]   ;;  %s873_s2 = inlined_call_operand.vmem [shape: f32[1,128], index: 2, kind: input, shape index: {}]   ;;  %s874_s3 = inlined_call_operand.hbm [shape: bf16[128,128], index: 3, kind: input, shape index: {}]   ;;  %s875_s4 = inlined_call_operand.vmem [shape: f32[1,128], index: 4, kind: input, shape index: {}]   ;;  %s876_s5 = inlined_call_operand.hbm [shape: bf16[128,256], index: 5, kind: input, shape index: {}]   ;;  %s877_s6 = inlined_call_operand.vmem [shape: f32[1,256], index: 6, kind: input, shape index: {}]   ;;  %s878_s7 = inlined_call_operand.hbm [shape: f32[8,256], index: 7, kind: output, shape index: {}]  }
   0x1   :  { %13 = vsyncpa [#allocation6], 0 }
   0x2   :  { %14 = vsyncpa [#allocation9], 0 }
   0x3   :  { %15 = vsyncpa [#allocation4], 0  ;;  %s744_s24 = smov [#allocation5]   ;;  %s626_s28 = scalar_lea.hbm %s872_s1, 1024 }
   0x4   :  { %s31_s25 = sshll.u32 %s744_s24, 4  ;;  %p627_p0 = scmp.ne.s32.totalorder %s872_s1, %s626_s28  ;;  %s32_s25 = int_to_ptr.vmem [resolvable:$true] %s31_s25 }
   0x5   :  { %p630_p1 = scmp.lt.u32.totalorder %s626_s28, %s872_s1 }
   0x7   :  { %p632_p2 = pnand %p630_p1, %p627_p0 }
   0x9   :  { %635 = shalt.err (!%p632_p2)
}
   0xa   :  { %s636_s10 = scalar_lea.vmem %s32_s25, 1024  ;;  %p641_p4 = scmp.lt.s32.totalorder %s32_s25, %s32_s25 }
   0xb   :  { %p637_p3 = scmp.ne.s32.totalorder %s32_s25, %s636_s10  ;;  %p642_p5 = scmp.lt.s32.totalorder %s636_s10, %s636_s10 }
   0xd   :  { %p643_p6 = por %p642_p5, %p641_p4 }
   0xf   :  { %p644_p7 = pnand %p643_p6, %p637_p3 }
  0x11   :  { %647 = shalt.err (!%p644_p7)
}
  0x12   :  { %s745_s11 = smov 64   ;;  %s746_s12 = smov 4  }
  0x13   :  { %37 = dma.hbm_to_vmem [thread:$0]  %s872_s1, 1024, %s32_s25, [#allocation6], %s745_s11, %s745_s11, %s746_s12  }
  0x14   :  { %s747_s15 = smov [#allocation2]   ;;  %s748_s17 = smov [#allocation7]  }
  0x15   :  { %s22_s16 = sshll.u32 %s747_s15, 4  ;;  %s45_s18 = sshll.u32 %s748_s17, 4  ;;  %s23_s16 = int_to_ptr.vmem [resolvable:$true] %s22_s16  ;;  %s46_s18 = int_to_ptr.vmem [resolvable:$true] %s45_s18 }
  0x16   :  { %s648_s21 = scalar_lea.hbm %s871_s0, 64 }
  0x17   :  { %p649_p8 = scmp.ne.s32.totalorder %s871_s0, %s648_s21  ;;  %p652_p9 = scmp.lt.u32.totalorder %s648_s21, %s871_s0 }
  0x19   :  { %p654_p10 = pnand %p652_p9, %p649_p8 }
  0x1b   :  { %657 = shalt.err (!%p654_p10)
}
  0x1c   :  { %s658_s1 = scalar_lea.vmem %s23_s16, 64  ;;  %p663_p12 = scmp.lt.s32.totalorder %s23_s16, %s23_s16 }
  0x1d   :  { %p659_p11 = scmp.ne.s32.totalorder %s23_s16, %s658_s1  ;;  %p664_p13 = scmp.lt.s32.totalorder %s658_s1, %s658_s1 }
  0x1f   :  { %p665_p0 = por %p664_p13, %p663_p12 }
  0x21   :  { %p666_p1 = pnand %p665_p0, %p659_p11 }
  0x23   :  { %669 = shalt.err (!%p666_p1)
}
  0x24   :  { %25 = dma.hbm_to_vmem [thread:$0]  %s871_s0, 64, %s23_s16, [#allocation3]  }
  0x25   :  { %s670_s30 = scalar_lea.hbm %s874_s3, 1024 }
  0x26   :  { %p671_p2 = scmp.ne.s32.totalorder %s874_s3, %s670_s30  ;;  %p674_p3 = scmp.lt.u32.totalorder %s670_s30, %s874_s3 }
  0x28   :  { %p676_p4 = pnand %p674_p3, %p671_p2 }
  0x2a   :  { %679 = shalt.err (!%p676_p4)
}
  0x2b   :  { %s680_s14 = scalar_lea.vmem %s46_s18, 1024  ;;  %p685_p6 = scmp.lt.s32.totalorder %s46_s18, %s46_s18 }
  0x2c   :  { %p681_p5 = scmp.ne.s32.totalorder %s46_s18, %s680_s14  ;;  %p686_p7 = scmp.lt.s32.totalorder %s680_s14, %s680_s14 }
  0x2e   :  { %p687_p8 = por %p686_p7, %p685_p6 }
  0x30   :  { %p688_p9 = pnand %p687_p8, %p681_p5 }
  0x32   :  { %691 = shalt.err (!%p688_p9)
}
  0x33   :  { %51 = dma.hbm_to_vmem [thread:$0]  %s874_s3, 1024, %s46_s18, [#allocation6], %s745_s11, %s745_s11, %s746_s12  }
  0x34   :  { %s749_s16 = smov [#allocation8]   ;;  %s692_s21 = scalar_lea.hbm %s876_s5, 2048 }
  0x35   :  { %s59_s17 = sshll.u32 %s749_s16, 4  ;;  %p693_p10 = scmp.ne.s32.totalorder %s876_s5, %s692_s21  ;;  %s60_s17 = int_to_ptr.vmem [resolvable:$true] %s59_s17 }
  0x36   :  { %p696_p11 = scmp.lt.u32.totalorder %s692_s21, %s876_s5 }
  0x38   :  { %p698_p12 = pnand %p696_p11, %p693_p10 }
  0x3a   :  { %701 = shalt.err (!%p698_p12)
}
  0x3b   :  { %s702_s1 = scalar_lea.vmem %s60_s17, 2048  ;;  %p707_p0 = scmp.lt.s32.totalorder %s60_s17, %s60_s17 }
  0x3c   :  { %p703_p13 = scmp.ne.s32.totalorder %s60_s17, %s702_s1  ;;  %p708_p1 = scmp.lt.s32.totalorder %s702_s1, %s702_s1 }
  0x3e   :  { %p709_p2 = por %p708_p1, %p707_p0 }
  0x40   :  { %p710_p3 = pnand %p709_p2, %p703_p13 }
  0x42   :  { %713 = shalt.err (!%p710_p3)
}
  0x43   :  { %s750_s3 = smov 128   ;;  %s751_s11 = smov 8  }
  0x44   :  { %65 = dma.hbm_to_vmem [thread:$0]  %s876_s5, 2048, %s60_s17, [#allocation9], %s750_s3, %s750_s3, %s751_s11  }
  0x45   :  { %736 = dma.done.wait [#allocation3], 64  }
  0x46   :  { %737 = vsyncadd [#allocation3], 4294967232 }
  0x47   :  { %738 = dma.done.wait [#allocation6], 2048  }
  0x48   :  { %739 = vsyncadd [#allocation6], 4294965248 }
  0x49   :  { %740 = dma.done.wait [#allocation9], 2048  }
  0x4a   :  { %741 = vsyncadd [#allocation9], 4294965248  ;;  %v752_v0 = vmov 0.0   ;;  %vm753_vm0 = vmmov 0   ;;  %v582_v1 = vld [vmem:[#allocation5] sm:$0xff]   ;;  %v583_v2 = vld [vmem:[#allocation5 + $0x8] sm:$0xff]   ;;  %v326_v51 = vlaneseq }
  0x4b   :  { %530 = vmatprep.subr.bf16.mxu0 %v752_v0  ;;  %546 = vmatprep.mubr.msk.bf16.mxu0 %vm753_vm0, %v752_v0  ;;  %v584_v3 = vld [vmem:[#allocation5 + $0x10] sm:$0xff]   ;;  %v590_v4 = vld [vmem:[#allocation7] sm:$0xff]   ;;  %v585_v5 = vld [vmem:[#allocation5 + $0x18] sm:$0xff]   ;;  %v754_v42 = vmov 0  }
  0x4c   :  { %550 = vmatprep.subr.bf16.mxu1 %v752_v0  ;;  %566 = vmatprep.mubr.msk.bf16.mxu1 %vm753_vm0, %v752_v0  ;;  %v591_v6 = vld [vmem:[#allocation7 + $0x8] sm:$0xff]   ;;  %v586_v7 = vld [vmem:[#allocation5 + $0x20] sm:$0xff]   ;;  %v592_v8 = vld [vmem:[#allocation7 + $0x10] sm:$0xff]   ;;  %v327_v52 = vshrl.u32 %v326_v51, 7 }
  0x4d   :  { %531 = vmatpush3.bf16.msra.mxu0 %v582_v1  ;;  %551 = vmatpush3.bf16.msra.mxu1 %v590_v4  ;;  %v587_v9 = vld [vmem:[#allocation5 + $0x28] sm:$0xff]   ;;  %v593_v10 = vld [vmem:[#allocation7 + $0x18] sm:$0xff]   ;;  %v588_v11 = vld [vmem:[#allocation5 + $0x30] sm:$0xff]  }
  0x4e   :  { %532 = vmatprep.subr.bf16.mxu0 %v752_v0  ;;  %552 = vmatprep.subr.bf16.mxu1 %v752_v0  ;;  %v594_v12 = vld [vmem:[#allocation7 + $0x20] sm:$0xff]   ;;  %v589_v13 = vld [vmem:[#allocation5 + $0x38] sm:$0xff]   ;;  %v595_v14 = vld [vmem:[#allocation7 + $0x28] sm:$0xff]   ;;  %v328_v53 = vsub.s32 0, %v327_v52  ;;  %v332_v55 = vsub.s32 1, %v327_v52 }
  0x4f   :  { %v81_v15 = vld [vmem:[#allocation2] sm:$0xf]  ;;  %v596_v16 = vld [vmem:[#allocation7 + $0x30] sm:$0xff]   ;;  %v598_v18 = vld [vmem:[#allocation8] ss:$8 sps:$4 sm:$0xff]  }
  0x50   :  { %v597_v17 = vld [vmem:[#allocation7 + $0x38] sm:$0xff]   ;;  %v600_v19 = vld [vmem:[#allocation8 + $0x4] ss:$8 sps:$4 sm:$0xff]   ;;  %v604_v23 = vld [vmem:[#allocation8 + $0x20] ss:$8 sps:$4 sm:$0xff]  }
  0x51   :  { %533 = vmatpush3.bf16.msra.mxu0 %v583_v2  ;;  %553 = vmatpush3.bf16.msra.mxu1 %v591_v6  ;;  %v603_v20 = vld [vmem:[#allocation8 + $0x14] ss:$8 sps:$4 sm:$0xff]   ;;  %v601_v21 = vld [vmem:[#allocation8 + $0x10] ss:$8 sps:$4 sm:$0xff]   ;;  %v606_v22 = vld [vmem:[#allocation8 + $0x24] ss:$8 sps:$4 sm:$0xff]  }
  0x52   :  { %534 = vmatprep.subr.bf16.mxu0 %v752_v0  ;;  %554 = vmatprep.subr.bf16.mxu1 %v752_v0  ;;  %v609_v24 = vld [vmem:[#allocation8 + $0x34] ss:$8 sps:$4 sm:$0xff]   ;;  %v607_v25 = vld [vmem:[#allocation8 + $0x30] ss:$8 sps:$4 sm:$0xff]   ;;  %v612_v26 = vld [vmem:[#allocation8 + $0x44] ss:$8 sps:$4 sm:$0xff]  }
  0x53   :  { %v610_v27 = vld [vmem:[#allocation8 + $0x40] ss:$8 sps:$4 sm:$0xff]   ;;  %v615_v28 = vld [vmem:[#allocation8 + $0x54] ss:$8 sps:$4 sm:$0xff]   ;;  %v613_v29 = vld [vmem:[#allocation8 + $0x50] ss:$8 sps:$4 sm:$0xff]  }
  0x54   :  { %v618_v30 = vld [vmem:[#allocation8 + $0x64] ss:$8 sps:$4 sm:$0xff]   ;;  %v616_v31 = vld [vmem:[#allocation8 + $0x60] ss:$8 sps:$4 sm:$0xff]   ;;  %v478_v32 = vld [vmem:[%s873_s2] ss:$0 sm:$0xff] }
  0x55   :  { %535 = vmatpush3.bf16.msra.mxu0 %v584_v3  ;;  %555 = vmatpush3.bf16.msra.mxu1 %v592_v8  ;;  %v621_v40 = vld [vmem:[#allocation8 + $0x74] ss:$8 sps:$4 sm:$0xff]   ;;  %v619_v41 = vld [vmem:[#allocation8 + $0x70] ss:$8 sps:$4 sm:$0xff]  }
  0x56   :  { %536 = vmatprep.subr.bf16.mxu0 %v752_v0  ;;  %556 = vmatprep.subr.bf16.mxu1 %v752_v0  ;;  %v487_v43 = vld [vmem:[%s875_s4] ss:$0 sm:$0xff]  ;;  %s755_s4 = smov [#allocation10]  }
  0x57   :  { %v324_v54 = vld [vmem:[%s877_s6] sm:$0x3]  ;;  %s467_s30 = sshll.u32 %s755_s4, 4  ;;  %s468_s30 = int_to_ptr.vmem [resolvable:$true] %s467_s30 }
  0x58   :  { %v329_v56 = vrot.slane %v324_v54, %v328_v53  ;;  %v333_v57 = vrot.slane %v324_v54, %v332_v55  ;;  %s714_s8 = scalar_lea.vmem %s468_s30, 256  ;;  %p719_p5 = scmp.lt.s32.totalorder %s468_s30, %s468_s30 }
  0x59   :  { %537 = vmatpush3.bf16.msra.mxu0 %v585_v5  ;;  %557 = vmatpush3.bf16.msra.mxu1 %v593_v10  ;;  %p715_p4 = scmp.ne.s32.totalorder %s468_s30, %s714_s8  ;;  %p720_p6 = scmp.lt.s32.totalorder %s714_s8, %s714_s8 }
  0x5a   :  { %538 = vmatprep.subr.bf16.mxu0 %v752_v0  ;;  %558 = vmatprep.subr.bf16.mxu1 %v752_v0 }
  0x5b   :  { %p721_p7 = por %p720_p6, %p719_p5 }
  0x5d   :  { %539 = vmatpush3.bf16.msra.mxu0 %v586_v7  ;;  %559 = vmatpush3.bf16.msra.mxu1 %v594_v12  ;;  %p722_p8 = pnand %p721_p7, %p715_p4 }
  0x5e   :  { %540 = vmatprep.subr.bf16.mxu0 %v752_v0  ;;  %560 = vmatprep.subr.bf16.mxu1 %v752_v0 }
  0x61   :  { %541 = vmatpush3.bf16.msra.mxu0 %v587_v9  ;;  %561 = vmatpush3.bf16.msra.mxu1 %v595_v14 }
  0x62   :  { %542 = vmatprep.subr.bf16.mxu0 %v752_v0  ;;  %562 = vmatprep.subr.bf16.mxu1 %v752_v0 }
  0x65   :  { %543 = vmatpush3.bf16.msra.mxu0 %v588_v11  ;;  %563 = vmatpush3.bf16.msra.mxu1 %v596_v16 }
  0x66   :  { %544 = vmatprep.subr.bf16.mxu0 %v752_v0  ;;  %564 = vmatprep.subr.bf16.mxu1 %v752_v0 }
  0x69   :  { %545 = vmatpush3.bf16.msra.mxu0 %v589_v13  ;;  %565 = vmatpush3.bf16.msra.mxu1 %v597_v17 }
  0x6a   :  { %416 = vmatprep.subr.bf16.mxu0 %v600_v19 }
  0x6c   :  { %547 = vmatmul.mubr.bf16.vlgmr.msra.gmra.mrb[0].mxu0 %v81_v15 }
  0x6d   :  { %417 = vmatpush1.bf16.msra.mxu0 %v598_v18  ;;  %448 = vmatprep.mubr.bf16.mxu0 %v754_v42 }
  0x6e   :  { %418 = vmatprep.subr.bf16.mxu0 %v603_v20 }
  0x71   :  { %419 = vmatpush1.bf16.msra.mxu0 %v601_v21 }
  0x72   :  { %420 = vmatprep.subr.bf16.mxu0 %v606_v22 }
  0x75   :  { %421 = vmatpush1.bf16.msra.mxu0 %v604_v23 }
  0x76   :  { %422 = vmatprep.subr.bf16.mxu0 %v609_v24 }
  0x79   :  { %423 = vmatpush1.bf16.msra.mxu0 %v607_v25 }
  0x7a   :  { %424 = vmatprep.subr.bf16.mxu0 %v612_v26 }
  0x7d   :  { %425 = vmatpush1.bf16.msra.mxu0 %v610_v27 }
  0x7e   :  { %426 = vmatprep.subr.bf16.mxu0 %v615_v28 }
  0x81   :  { %427 = vmatpush1.bf16.msra.mxu0 %v613_v29 }
  0x82   :  { %428 = vmatprep.subr.bf16.mxu0 %v618_v30 }
  0x85   :  { %429 = vmatpush1.bf16.msra.mxu0 %v616_v31 }
  0x86   :  { %430 = vmatprep.subr.bf16.mxu0 %v621_v40 }
  0x89   :  { %431 = vmatpush1.bf16.msra.mxu0 %v619_v41 }
 0x13f   :  { %v187_v33 = vpop.f32.mrb[0].mxu0 }
 0x140   :  { %v188_v34 = vadd.f32 %v478_v32, %v187_v33  ;;  %v548_v35 = vpop.f32.mrb[1].mxu0 }
 0x141   :  { %v190_v36 = vpop.f32.mrb[2].mxu0 }
 0x142   :  { %v193_v37 = vmax.f32 %v188_v34, 0.0  ;;  %v549_v38 = vpop.f32.mrb[3].mxu0 }
 0x144   :  { %v194_v39 = vpack.c.bf16 %v193_v37, %v193_v37 }
 0x146   :  { %567 = vmatmul.mubr.bf16.vlgmr.msra.gmra.mrb[0].mxu1 %v194_v39 }
 0x219   :  { %v300_v44 = vpop.f32.mrb[0].mxu1 }
 0x21a   :  { %v301_v45 = vadd.f32 %v487_v43, %v300_v44  ;;  %v568_v46 = vpop.f32.mrb[1].mxu1 }
 0x21b   :  { %v303_v47 = vpop.f32.mrb[2].mxu1 }
 0x21c   :  { %v306_v48 = vmax.f32 %v301_v45, 0.0  ;;  %v569_v49 = vpop.f32.mrb[3].mxu1 }
 0x21e   :  { %v307_v50 = vpack.c.bf16 %v306_v48, %v306_v48 }
 0x220   :  { %449 = vmatmul.mubr.bf16.vlgmr.msra.gmra.mrb[4].mxu0 %v307_v50 }
 0x2f3   :  { %v450_v58 = vpop.f32.mrb[4].mxu0 }
 0x2f4   :  { %v451_v59 = vadd.f32 %v450_v58, %v329_v56  ;;  %v452_v60 = vpop.f32.mrb[5].mxu0 }
 0x2f5   :  { %v453_v61 = vadd.f32 %v452_v60, %v333_v57  ;;  %v454_v62 = vpop.f32.mrb[6].mxu0 }
 0x2f6   :  { %622 = vtanh.f32 %v451_v59  ;;  %v455_v63 = vpop.f32.mrb[7].mxu0 }
 0x2f7   :  { %624 = vtanh.f32 %v453_v61 }
 0x300   :  { %v623_v0 = vpop.eup %622 }
 0x301   :  { %v625_v1 = vpop.eup %624  ;;  %459 = vst [vmem:[#allocation10] sm:$0xff] %v623_v0 }
 0x302   :  { %460 = vst [vmem:[#allocation10 + $0x8] sm:$0xff] %v625_v1 }
 0x303   :  { %725 = shalt.err (!%p722_p8)
}
 0x304   :  { %s726_s10 = scalar_lea.hbm %s878_s7, 256 }
 0x305   :  { %p727_p9 = scmp.ne.s32.totalorder %s878_s7, %s726_s10  ;;  %p730_p10 = scmp.lt.u32.totalorder %s726_s10, %s878_s7 }
 0x307   :  { %p732_p11 = pnand %p730_p10, %p727_p9 }
 0x309   :  { %735 = shalt.err (!%p732_p11)
}
 0x30a   :  { %470 = dma.vmem_to_hbm [thread:$0]  %s468_s30, 256, %s878_s7, [#allocation4]  }
 0x30b   :  { %742 = dma.done.wait [#allocation4], 256  }
 0x30c   :  { %743 = vsyncadd [#allocation4], 4294967040 }
 0x30d   :  { %474 = vsyncpa [#allocation3], 1 }
 0x30e   :  { %475 = vsyncpa [#allocation6], 1 }
 0x30f   :  { %476 = vsyncpa [#allocation9], 1 }
 0x310   :  { %477 = vsyncpa [#allocation4], 1 }

</bundles_post_ra>
